<compile_context>
chip_gen: v7x
topology: tpu7x:2x2x1
jax: 0.10.0
libtpu: 0.0.40
codegen_flags: <defaults>
</compile_context>

<pallas_src>
import jax
import jax.numpy as jnp
from jax import lax
from jax.experimental import pallas as pl
from jax.experimental.pallas import tpu as pltpu


def rnn_kernel(x_ref, h0_ref, wih_ref, whh_ref, b_ref, out_ref):
    """Whole-sequence RNN forward in one invocation.

    x_ref   : (B*T, I)  flattened batch-first input rows
    h0_ref  : (1, B, H) initial hidden state (as given to the module)
    wih_ref : (H, I)    W_ih (un-transposed; dot_general contracts dim 1)
    whh_ref : (H, H)    W_hh (un-transposed; dot_general contracts dim 1)
    b_ref   : (1, H)    b_ih + b_hh (folded once in the wrapper)
    out_ref : (B, T, H) all hidden states, batch-first (single bulk store)
    """
    B, T, H = out_ref.shape

    # ---- Phase 1: input projection for ALL time steps ----------------------
    # One 2-D MXU matmul (x @ W_ih^T) + one bias broadcast, hoisted out of the
    # serial recurrence.  No transposed-weight materialization, no batching.
    xw = lax.dot_general(
        x_ref[...], wih_ref[...],
        dimension_numbers=(((1,), (1,)), ((), ())),
        preferred_element_type=jnp.float32) + b_ref[...]            # (B*T, H)

    # Hold the projection time-major so each step reads a free leading-axis
    # slice; the one sublane shuffle here is off the serial critical path.
    xw_tm = jnp.transpose(xw.reshape(B, T, H), (1, 0, 2))           # (T, B, H)

    # ---- Loop invariants, loaded to vregs once ------------------------------
    whh = whh_ref[...]          # (H, H)
    h = h0_ref[0]               # (B, H) f32

    # ---- Phase 2: the truly-sequential recurrence, fully unrolled ----------
    # Per step: one (B,H)x(H,H)^T MXU push, one add, one tanh (EUP).
    # TODO(synk): at MXU-tile-sized H keep W_hh resident across steps via
    # pltpu.matmul_push_rhs/matmul_acc_lhs/matmul_pop, and switch to
    # lax.fori_loop(..., unroll=small) with streamed xw once T grows large.
    hs = []
    for t in range(T):
        h = jnp.tanh(
            xw_tm[t]
            + lax.dot_general(h, whh,
                              dimension_numbers=(((1,), (1,)), ((), ())),
                              preferred_element_type=jnp.float32))
        hs.append(h)

    # ---- Single bulk store, emitted directly in (B, T, H) ------------------
    # (no per-step masked vst, no wrapper-side transpose of the result).
    out_ref[...] = jnp.stack(hs, axis=1).astype(out_ref.dtype)


@jax.jit
def rnn_forward(x, h0, w_ih, w_hh, b_ih, b_hh):
    """op = nn.RNN(I, H, batch_first=True)(x, h0)[0]

    x   : (B, T, I) f32
    h0  : (1, B, H) f32
    w_ih: (H, I), w_hh: (H, H), b_ih: (H,), b_hh: (H,)
    returns (B, T, H)
    """
    B, T, I = x.shape
    H = w_ih.shape[0]

    # Only wrapper-side preprocessing: a contiguous (free) reshape of x and a
    # single bias fold (also saves one kernel-entry DMA).  Weights are passed
    # un-transposed; the kernel contracts on their dim 1 via dot_general.
    x2 = x.reshape(B * T, I)
    b2 = (b_ih + b_hh).reshape(1, H)

    return pl.pallas_call(
        rnn_kernel,
        out_shape=jax.ShapeDtypeStruct((B, T, H), x.dtype),
        # No grid: the whole problem is one block.  Every operand is a single
        # full-array VMEM block (~12 KB total); the output is written back to
        # HBM with one DMA at kernel exit.
        in_specs=[pl.BlockSpec(memory_space=pltpu.MemorySpace.VMEM)] * 5,
        out_specs=pl.BlockSpec(memory_space=pltpu.MemorySpace.VMEM),
    )(x2, h0, w_ih, w_hh, b2)


def rnn_reference(x, h0, w_ih, w_hh, b_ih, b_hh):
    """Pure-JAX reference matching torch.nn.RNN (tanh, 1 layer, batch_first)."""
    def step(h, x_t):
        h_new = jnp.tanh(x_t @ w_ih.T + b_ih + h @ w_hh.T + b_hh)
        return h_new, h_new
    x_tm = jnp.transpose(x, (1, 0, 2))        # (T, B, I)
    _, out_tm = jax.lax.scan(step, h0[0], x_tm)
    return jnp.transpose(out_tm, (1, 0, 2))


if __name__ == "__main__":
    # Small shapes consistent with the module's forward.
    B, T, I, H = 2, 8, 16, 32

    key = jax.random.PRNGKey(0)
    kx, kh, k1, k2, k3, k4 = jax.random.split(key, 6)

    x = jax.random.normal(kx, (B, T, I), dtype=jnp.float32)
    h0 = jax.random.normal(kh, (1, B, H), dtype=jnp.float32)

    # Parameter init mimicking PyTorch's U(-1/sqrt(H), 1/sqrt(H)).
    bound = 1.0 / float(H) ** 0.5
    w_ih = jax.random.uniform(k1, (H, I), jnp.float32, -bound, bound)
    w_hh = jax.random.uniform(k2, (H, H), jnp.float32, -bound, bound)
    b_ih = jax.random.uniform(k3, (H,), jnp.float32, -bound, bound)
    b_hh = jax.random.uniform(k4, (H,), jnp.float32, -bound, bound)

    out = jax.block_until_ready(rnn_forward(x, h0, w_ih, w_hh, b_ih, b_hh))
    ref = rnn_reference(x, h0, w_ih, w_hh, b_ih, b_hh)

    assert out.shape == (B, T, H)
    assert jnp.allclose(out, ref, atol=1e-5, rtol=1e-5), "mismatch vs reference"

    print("KERNEL_OK")
</pallas_src>

<mosaic_0001>
module attributes {stable_mosaic.version = 11 : i64} {
  func.func @rnn_kernel(%arg0: memref<16x16xf32, #tpu.memory_space<vmem>>, %arg1: memref<1x2x32xf32, #tpu.memory_space<vmem>>, %arg2: memref<32x16xf32, #tpu.memory_space<vmem>>, %arg3: memref<32x32xf32, #tpu.memory_space<vmem>>, %arg4: memref<1x32xf32, #tpu.memory_space<vmem>>, %arg5: memref<2x8x32xf32, #tpu.memory_space<vmem>>) attributes {dimension_semantics = [], scalar_prefetch = 0 : i64, scratch_operands = 0 : i64, tpu.core_type = #tpu.core_type<tc>} {
    %c0 = arith.constant 0 : index
    %c0_0 = arith.constant 0 : index
    %0 = vector.load %arg0[%c0, %c0_0] : memref<16x16xf32, #tpu.memory_space<vmem>>, vector<16x16xf32>
    %c0_1 = arith.constant 0 : index
    %c0_2 = arith.constant 0 : index
    %1 = vector.load %arg2[%c0_1, %c0_2] : memref<32x16xf32, #tpu.memory_space<vmem>>, vector<32x16xf32>
    %cst = arith.constant dense<0.000000e+00> : vector<16x32xf32>
    %2 = tpu.matmul %0, %1, %cst {dimension_numbers = #tpu.dot_dimension_numbers<[1], [1], [0], [0], [0, 0, 1, 0], [], []>} : vector<16x16xf32>, vector<32x16xf32>, vector<16x32xf32> -> vector<16x32xf32>
    %c0_3 = arith.constant 0 : index
    %c0_4 = arith.constant 0 : index
    %3 = vector.load %arg4[%c0_3, %c0_4] : memref<1x32xf32, #tpu.memory_space<vmem>>, vector<1x32xf32>
    %4 = vector.broadcast %3 : vector<1x32xf32> to vector<16x32xf32>
    %5 = arith.addf %2, %4 : vector<16x32xf32>
    %6 = vector.shape_cast %5 : vector<16x32xf32> to vector<2x8x32xf32>
    %7 = tpu.transpose %6, [1, 0, 2] : vector<2x8x32xf32> -> vector<8x2x32xf32>
    %c0_5 = arith.constant 0 : index
    %c0_6 = arith.constant 0 : index
    %8 = vector.load %arg3[%c0_5, %c0_6] : memref<32x32xf32, #tpu.memory_space<vmem>>, vector<32x32xf32>
    %c0_7 = arith.constant 0 : index
    %c0_8 = arith.constant 0 : index
    %c0_9 = arith.constant 0 : index
    %9 = vector.load %arg1[%c0_7, %c0_8, %c0_9] : memref<1x2x32xf32, #tpu.memory_space<vmem>>, vector<1x2x32xf32>
    %10 = vector.shape_cast %9 : vector<1x2x32xf32> to vector<2x32xf32>
    %11 = vector.extract_strided_slice %7 {offsets = [0, 0, 0], sizes = [1, 2, 32], strides = [1, 1, 1]} : vector<8x2x32xf32> to vector<1x2x32xf32>
    %12 = vector.shape_cast %11 : vector<1x2x32xf32> to vector<2x32xf32>
    %cst_10 = arith.constant dense<0.000000e+00> : vector<2x32xf32>
    %13 = tpu.matmul %10, %8, %cst_10 {dimension_numbers = #tpu.dot_dimension_numbers<[1], [1], [0], [0], [0, 0, 1, 0], [], []>} : vector<2x32xf32>, vector<32x32xf32>, vector<2x32xf32> -> vector<2x32xf32>
    %14 = arith.addf %12, %13 : vector<2x32xf32>
    %15 = math.tanh %14 : vector<2x32xf32>
    %16 = vector.extract_strided_slice %7 {offsets = [1, 0, 0], sizes = [1, 2, 32], strides = [1, 1, 1]} : vector<8x2x32xf32> to vector<1x2x32xf32>
    %17 = vector.shape_cast %16 : vector<1x2x32xf32> to vector<2x32xf32>
    %cst_11 = arith.constant dense<0.000000e+00> : vector<2x32xf32>
    %18 = tpu.matmul %15, %8, %cst_11 {dimension_numbers = #tpu.dot_dimension_numbers<[1], [1], [0], [0], [0, 0, 1, 0], [], []>} : vector<2x32xf32>, vector<32x32xf32>, vector<2x32xf32> -> vector<2x32xf32>
    %19 = arith.addf %17, %18 : vector<2x32xf32>
    %20 = math.tanh %19 : vector<2x32xf32>
    %21 = vector.extract_strided_slice %7 {offsets = [2, 0, 0], sizes = [1, 2, 32], strides = [1, 1, 1]} : vector<8x2x32xf32> to vector<1x2x32xf32>
    %22 = vector.shape_cast %21 : vector<1x2x32xf32> to vector<2x32xf32>
    %cst_12 = arith.constant dense<0.000000e+00> : vector<2x32xf32>
    %23 = tpu.matmul %20, %8, %cst_12 {dimension_numbers = #tpu.dot_dimension_numbers<[1], [1], [0], [0], [0, 0, 1, 0], [], []>} : vector<2x32xf32>, vector<32x32xf32>, vector<2x32xf32> -> vector<2x32xf32>
    %24 = arith.addf %22, %23 : vector<2x32xf32>
    %25 = math.tanh %24 : vector<2x32xf32>
    %26 = vector.extract_strided_slice %7 {offsets = [3, 0, 0], sizes = [1, 2, 32], strides = [1, 1, 1]} : vector<8x2x32xf32> to vector<1x2x32xf32>
    %27 = vector.shape_cast %26 : vector<1x2x32xf32> to vector<2x32xf32>
    %cst_13 = arith.constant dense<0.000000e+00> : vector<2x32xf32>
    %28 = tpu.matmul %25, %8, %cst_13 {dimension_numbers = #tpu.dot_dimension_numbers<[1], [1], [0], [0], [0, 0, 1, 0], [], []>} : vector<2x32xf32>, vector<32x32xf32>, vector<2x32xf32> -> vector<2x32xf32>
    %29 = arith.addf %27, %28 : vector<2x32xf32>
    %30 = math.tanh %29 : vector<2x32xf32>
    %31 = vector.extract_strided_slice %7 {offsets = [4, 0, 0], sizes = [1, 2, 32], strides = [1, 1, 1]} : vector<8x2x32xf32> to vector<1x2x32xf32>
    %32 = vector.shape_cast %31 : vector<1x2x32xf32> to vector<2x32xf32>
    %cst_14 = arith.constant dense<0.000000e+00> : vector<2x32xf32>
    %33 = tpu.matmul %30, %8, %cst_14 {dimension_numbers = #tpu.dot_dimension_numbers<[1], [1], [0], [0], [0, 0, 1, 0], [], []>} : vector<2x32xf32>, vector<32x32xf32>, vector<2x32xf32> -> vector<2x32xf32>
    %34 = arith.addf %32, %33 : vector<2x32xf32>
    %35 = math.tanh %34 : vector<2x32xf32>
    %36 = vector.extract_strided_slice %7 {offsets = [5, 0, 0], sizes = [1, 2, 32], strides = [1, 1, 1]} : vector<8x2x32xf32> to vector<1x2x32xf32>
    %37 = vector.shape_cast %36 : vector<1x2x32xf32> to vector<2x32xf32>
    %cst_15 = arith.constant dense<0.000000e+00> : vector<2x32xf32>
    %38 = tpu.matmul %35, %8, %cst_15 {dimension_numbers = #tpu.dot_dimension_numbers<[1], [1], [0], [0], [0, 0, 1, 0], [], []>} : vector<2x32xf32>, vector<32x32xf32>, vector<2x32xf32> -> vector<2x32xf32>
    %39 = arith.addf %37, %38 : vector<2x32xf32>
    %40 = math.tanh %39 : vector<2x32xf32>
    %41 = vector.extract_strided_slice %7 {offsets = [6, 0, 0], sizes = [1, 2, 32], strides = [1, 1, 1]} : vector<8x2x32xf32> to vector<1x2x32xf32>
    %42 = vector.shape_cast %41 : vector<1x2x32xf32> to vector<2x32xf32>
    %cst_16 = arith.constant dense<0.000000e+00> : vector<2x32xf32>
    %43 = tpu.matmul %40, %8, %cst_16 {dimension_numbers = #tpu.dot_dimension_numbers<[1], [1], [0], [0], [0, 0, 1, 0], [], []>} : vector<2x32xf32>, vector<32x32xf32>, vector<2x32xf32> -> vector<2x32xf32>
    %44 = arith.addf %42, %43 : vector<2x32xf32>
    %45 = math.tanh %44 : vector<2x32xf32>
    %46 = vector.extract_strided_slice %7 {offsets = [7, 0, 0], sizes = [1, 2, 32], strides = [1, 1, 1]} : vector<8x2x32xf32> to vector<1x2x32xf32>
    %47 = vector.shape_cast %46 : vector<1x2x32xf32> to vector<2x32xf32>
    %cst_17 = arith.constant dense<0.000000e+00> : vector<2x32xf32>
    %48 = tpu.matmul %45, %8, %cst_17 {dimension_numbers = #tpu.dot_dimension_numbers<[1], [1], [0], [0], [0, 0, 1, 0], [], []>} : vector<2x32xf32>, vector<32x32xf32>, vector<2x32xf32> -> vector<2x32xf32>
    %49 = arith.addf %47, %48 : vector<2x32xf32>
    %50 = math.tanh %49 : vector<2x32xf32>
    %51 = vector.shape_cast %15 : vector<2x32xf32> to vector<2x1x32xf32>
    %52 = vector.shape_cast %20 : vector<2x32xf32> to vector<2x1x32xf32>
    %53 = vector.shape_cast %25 : vector<2x32xf32> to vector<2x1x32xf32>
    %54 = vector.shape_cast %30 : vector<2x32xf32> to vector<2x1x32xf32>
    %55 = vector.shape_cast %35 : vector<2x32xf32> to vector<2x1x32xf32>
    %56 = vector.shape_cast %40 : vector<2x32xf32> to vector<2x1x32xf32>
    %57 = vector.shape_cast %45 : vector<2x32xf32> to vector<2x1x32xf32>
    %58 = vector.shape_cast %50 : vector<2x32xf32> to vector<2x1x32xf32>
    %59 = tpu.concatenate %51, %52, %53, %54, %55, %56, %57, %58 in 1 : vector<2x1x32xf32>, vector<2x1x32xf32>, vector<2x1x32xf32>, vector<2x1x32xf32>, vector<2x1x32xf32>, vector<2x1x32xf32>, vector<2x1x32xf32>, vector<2x1x32xf32> -> vector<2x8x32xf32>
    %c0_18 = arith.constant 0 : index
    %c0_19 = arith.constant 0 : index
    %c0_20 = arith.constant 0 : index
    %60 = vector.load %arg5[%c0_18, %c0_19, %c0_20] : memref<2x8x32xf32, #tpu.memory_space<vmem>>, vector<2x8x32xf32>
    tpu.vector_store %arg5[%c0_18, %c0_19, %c0_20], %59 {strides = array<i32>} : memref<2x8x32xf32, #tpu.memory_space<vmem>>, vector<2x8x32xf32>,
    return
  }
}

</mosaic_0001>

<bundles_post_ra>
// kernel: rnn_forward.1
= control target key start
LH: loop header
LB: loop body
LE: loop exit
PB: predicated region body
PF: predicated region fallthrough
CT: control target
= control target key end

     0   :  { %vm34_vm0 = vcmask 130048   ;;  %vm199_vm1 = vcmask 261120   ;;  %v1417_v6 = vmov 0.0|0.0   ;;  %vm1418_vm4 = vmmov 0   ;;  %s1680_s0 = inlined_call_operand.vmem [shape: f32[16,16], index: 0, kind: input, shape index: {}]   ;;  %s1681_s1 = inlined_call_operand.vmem [shape: f32[1,2,32], index: 1, kind: input, shape index: {}]   ;;  %s1682_s2 = inlined_call_operand.vmem [shape: f32[32,16], index: 2, kind: input, shape index: {}]   ;;  %s1683_s3 = inlined_call_operand.vmem [shape: f32[32,32], index: 3, kind: input, shape index: {}]   ;;  %s1684_s4 = inlined_call_operand.vmem [shape: f32[1,32], index: 4, kind: input, shape index: {}]   ;;  %s1685_s5 = inlined_call_operand.hbm [shape: f32[2,8,32], index: 5, kind: output, shape index: {}]  }
   0x1   :  { %v23_v0 = vld [vmem:[%s1682_s2] sm:$0xff]  ;;  %v24_v1 = vld [vmem:[%s1682_s2 + $0x8] sm:$0xff]  ;;  %v25_v2 = vld [vmem:[%s1682_s2 + $0x10] sm:$0xff]  ;;  %1304 = vmatprep.subr.bf16.mxu1 %v1417_v6  ;;  %v1419_v12 = vmov 0.0  }
   0x2   :  { %v1292_v3 = vpack.c.bf16 %v24_v1, %v23_v0  ;;  %vm1467_vm2 = vmpackc.low %vm34_vm0, %vm34_vm0  ;;  %v26_v5 = vld [vmem:[%s1682_s2 + $0x18] sm:$0xff]  ;;  %v194_v7 = vld [vmem:[%s1683_s3] sm:$0xff]  ;;  %1212 = vmatprep.mubr.msk.f32.mxu1 %vm1418_vm4, %v1419_v12 }
   0x3   :  { %v1298_v8 = vpack.c.bf16 %v26_v5, %v25_v2  ;;  %v195_v9 = vld [vmem:[%s1683_s3 + $0x8] sm:$0xff]  ;;  %vm1483_vm3 = vmpackc.low %vm199_vm1, %vm199_vm1  ;;  %v21_v11 = vld [vmem:[%s1680_s0] sm:$0xff] }
   0x4   :  { %1294 = vmatprep.subr.msk.bf16.mxu0 %vm1467_vm2, %v1292_v3  ;;  %v1494_v13 = vpack.c.bf16 %v195_v9, %v194_v7  ;;  %1201 = vmatprep.mubr.msk.f32.mxu0 %vm34_vm0, %v21_v11 }
   0x5   :  { %1297 = vmatpush3.bf16.xpose.msk.msra.mxu0 %vm1467_vm2, %v1292_v3 }
   0x6   :  { %10 = vsyncpa [#allocation3], 0  ;;  %1300 = vmatprep.subr.msk.bf16.mxu0 %vm1467_vm2, %v1298_v8  ;;  %1307 = vmatpush3.bf16.xpose.msk.msra.mxu1 %vm1483_vm3, %v1494_v13  ;;  %v196_v14 = vld [vmem:[%s1683_s3 + $0x10] sm:$0xff]  ;;  %v197_v15 = vld [vmem:[%s1683_s3 + $0x18] sm:$0xff]  ;;  %v1420_v19 = vmov 1983009808   ;;  %v132_v21 = vlaneseq }
   0x7   :  { %1308 = vmatprep.subr.bf16.mxu1 %v1417_v6  ;;  %v1511_v16 = vpack.c.bf16 %v197_v15, %v196_v14  ;;  %v22_v17 = vld [vmem:[%s1680_s0 + $0x8] sm:$0xff]  ;;  %v198_v18 = vld [vmem:[%s1681_s1] sm:$0x3]  ;;  %v130_v20 = vunpack.c.l.s4 %v1420_v19  ;;  %v1421_v24 = vmov 1934713408   ;;  %vm1061_vm5 = vcmask 1040384  }
   0x8   :  { %v133_v23 = vshrl.u32 %v132_v21, 7  ;;  %v161_v25 = vunpack.c.l.s4 %v1421_v24  ;;  %v1100_v26 = vld [vmem:[%s1684_s4] ss:$0 sm:$0xff]  ;;  %v1422_v50 = vmov 1966171168   ;;  %vm1064_vm6 = vcmask 1041408  }
   0x9   :  { %v131_v22 = vunpack.c.0.s8 %v130_v20  ;;  %v813_v51 = vunpack.c.l.s4 %v1422_v50  ;;  %vm1067_vm7 = vcmask 1042432   ;;  %vm1070_vm8 = vcmask 1043456   ;;  %s1423_s3 = smov [#allocation2]  }
   0xa   :  { %v162_v29 = vunpack.c.0.s8 %v161_v25  ;;  %v1576_v1 = vsub.s32 0, %v133_v23  ;;  %vm1073_vm9 = vcmask 1044480   ;;  %vm1076_vm10 = vcmask 1045504   ;;  %s1089_s4 = sshll.u32 %s1423_s3, 4  ;;  %s1090_s4 = int_to_ptr.vmem [resolvable:$true] %s1089_s4 }
   0xb   :  { %v134_v27 = vsub.s32 %v131_v22, %v133_v23  ;;  %v814_v53 = vunpack.c.0.s8 %v813_v51  ;;  %vm1079_vm11 = vcmask 1046528   ;;  %s1393_s14 = scalar_lea.vmem %s1090_s4, 256  ;;  %p1398_p1 = scmp.lt.s32.totalorder %s1090_s4, %s1090_s4 }
   0xc   :  { %v165_v39 = vsub.s32 %v162_v29, %v133_v23  ;;  %p1394_p0 = scmp.ne.s32.totalorder %s1090_s4, %s1393_s14  ;;  %p1399_p2 = scmp.lt.s32.totalorder %s1393_s14, %s1393_s14 }
   0xd   :  { %1303 = vmatpush3.bf16.xpose.msk.msra.mxu0 %vm1467_vm2, %v1298_v8  ;;  %v1559_v54 = vsub.s32 %v814_v53, %v133_v23 }
   0xe   :  { %1311 = vmatpush3.bf16.xpose.msk.msra.mxu1 %vm1483_vm3, %v1511_v16  ;;  %1312 = vmatprep.subr.bf16.mxu0 %v1417_v6  ;;  %p1400_p3 = por %p1399_p2, %p1398_p1 }
   0xf   :  { %1320 = vmatprep.subr.bf16.mxu1 %v1417_v6 }
  0x10   :  { %p1401_p4 = pnand %p1400_p3, %p1394_p0 }
  0x14   :  { %1202 = vmatmul.mubr.msk.f32.vlgmr.msra.gmra.mrb[0].mxu0 %vm34_vm0, %v22_v17 }
  0x15   :  { %1213 = vmatmul.mubr.msk.f32.vlgmr.msra.gmra.mrb[0].mxu1 %vm199_vm1, %v198_v18  ;;  %1315 = vmatpush3.bf16.xpose.msk.msra.mxu0 %vm1483_vm3, %v1494_v13 }
  0x16   :  { %1316 = vmatprep.subr.bf16.mxu0 %v1417_v6  ;;  %1223 = vmatprep.mubr.msk.f32.mxu0 %vm1418_vm4, %v1419_v12 }
  0x17   :  { %1323 = vmatpush3.bf16.xpose.msk.msra.mxu1 %vm1483_vm3, %v1494_v13  ;;  %1234 = vmatprep.mubr.msk.f32.mxu1 %vm1418_vm4, %v1419_v12 }
  0x18   :  { %1324 = vmatprep.subr.bf16.mxu1 %v1417_v6 }
  0x1d   :  { %1319 = vmatpush3.bf16.xpose.msk.msra.mxu0 %vm1483_vm3, %v1511_v16 }
  0x1e   :  { %1328 = vmatprep.subr.bf16.mxu0 %v1417_v6 }
  0x1f   :  { %1327 = vmatpush3.bf16.xpose.msk.msra.mxu1 %vm1483_vm3, %v1511_v16 }
  0x20   :  { %1336 = vmatprep.subr.bf16.mxu1 %v1417_v6 }
  0xe7   :  { %v1203_v28 = vpop.f32.mrb[0].mxu0 }
  0xe8   :  { %v125_v30 = vadd.f32 %v1203_v28, %v1100_v26  ;;  %v119_v31 = vpop.f32.mrb[1].mxu0  ;;  %v281_v32 = vpop.f32.mrb[0].mxu1 }
  0xe9   :  { %v120_v33 = vadd.f32 %v1100_v26, %v119_v31  ;;  %v1214_v34 = vpop.f32.mrb[1].mxu1 }
  0xea   :  { %v143_v35 = vcombine.high %v125_v30, %v1419_v12  ;;  %v150_v36 = vrot.slane %v125_v30, %v134_v27 }
  0xeb   :  { %v128_v37 = vcombine.high %v120_v33, %v1419_v12  ;;  %v135_v38 = vrot.slane %v120_v33, %v134_v27 }
  0xec   :  { %v157_v40 = vrot.slane %v143_v35, %v134_v27 }
  0xed   :  { %v142_v41 = vrot.slane %v128_v37, %v134_v27  ;;  %v158_v42 = vcombine.low %v135_v38, %v150_v36  ;;  %v159_v43 = vcombine.high %v135_v38, %v150_v36 }
  0xef   :  { %v166_v44 = vrot.slane %v158_v42, %v165_v39  ;;  %v1553_v45 = vrot.slane %v159_v43, %v165_v39  ;;  %v174_v46 = vcombine.low %v142_v41, %v157_v40  ;;  %v175_v47 = vcombine.high %v142_v41, %v157_v40 }
  0xf1   :  { %v285_v48 = vadd.f32 %v281_v32, %v166_v44  ;;  %v1555_v49 = vrot.slane %v174_v46, %v165_v39  ;;  %v1557_v52 = vrot.slane %v175_v47, %v165_v39  ;;  %v190_v60 = vcombine.high %v166_v44, %v1419_v12 }
  0xf2   :  { %v191_v27 = vcombine.high %v1553_v45, %v1419_v12 }
  0xf3   :  { %1377 = vtanh.f32 %v285_v48 }
  0xfd   :  { %v1378_v55 = vpop.eup %1377 }
  0xfe   :  { %v818_v56 = vrot.slane %v1378_v55, %v1559_v54  ;;  %1224 = vmatmul.mubr.msk.f32.vlgmr.msra.gmra.mrb[2].mxu0 %vm199_vm1, %v1378_v55 }
  0xff   :  { %1331 = vmatpush3.bf16.xpose.msk.msra.mxu0 %vm1483_vm3, %v1494_v13  ;;  %1245 = vmatprep.mubr.msk.f32.mxu0 %vm1418_vm4, %v1419_v12 }
 0x100   :  { %v819_v57 = vcombine.high %v818_v56, %v818_v56  ;;  %v826_v58 = vrot.slane %v818_v56, %v1559_v54  ;;  %1332 = vmatprep.subr.bf16.mxu0 %v1417_v6 }
 0x102   :  { %v833_v59 = vrot.slane %v819_v57, %v1559_v54 }
 0x107   :  { %1335 = vmatpush3.bf16.xpose.msk.msra.mxu0 %vm1483_vm3, %v1511_v16 }
 0x108   :  { %1344 = vmatprep.subr.bf16.mxu0 %v1417_v6 }
 0x1d1   :  { %v356_v61 = vpop.f32.mrb[2].mxu0 }
 0x1d2   :  { %v360_v62 = vadd.f32 %v356_v61, %v190_v60  ;;  %v1225_v63 = vpop.f32.mrb[3].mxu0 }
 0x1d4   :  { %1379 = vtanh.f32 %v360_v62 }
 0x1de   :  { %v1380_v0 = vpop.eup %1379 }
 0x1df   :  { %v842_v2 = vrot.slane %v1380_v0, %v1559_v54  ;;  %1235 = vmatmul.mubr.msk.f32.vlgmr.msra.gmra.mrb[2].mxu1 %vm199_vm1, %v1380_v0 }
 0x1e0   :  { %1339 = vmatpush3.bf16.xpose.msk.msra.mxu1 %vm1483_vm3, %v1494_v13  ;;  %1256 = vmatprep.mubr.msk.f32.mxu1 %vm1418_vm4, %v1419_v12 }
 0x1e1   :  { %v843_v3 = vcombine.high %v842_v2, %v842_v2  ;;  %v850_v4 = vrot.slane %v842_v2, %v1559_v54  ;;  %1340 = vmatprep.subr.bf16.mxu1 %v1417_v6 }
 0x1e3   :  { %v857_v5 = vrot.slane %v843_v3, %v1559_v54  ;;  %v994_v7 = vrot.slane %v850_v4, %v1576_v1 }
 0x1e5   :  { %v998_v8 = vrot.slane %v857_v5, %v1576_v1  ;;  %v1062_v9 = vsel %vm1061_vm5, %v826_v58, %v994_v7 }
 0x1e7   :  { %v1063_v11 = vsel %vm1061_vm5, %v833_v59, %v998_v8 }
 0x1e8   :  { %1343 = vmatpush3.bf16.xpose.msk.msra.mxu1 %vm1483_vm3, %v1511_v16 }
 0x1e9   :  { %1352 = vmatprep.subr.bf16.mxu1 %v1417_v6 }
 0x2b2   :  { %v431_v14 = vpop.f32.mrb[2].mxu1 }
 0x2b3   :  { %v435_v15 = vadd.f32 %v431_v14, %v1553_v45  ;;  %v1236_v17 = vpop.f32.mrb[3].mxu1 }
 0x2b4   :  { %v193_v17 = vcombine.high %v1557_v52, %v1419_v12 }
 0x2b5   :  { %1381 = vtanh.f32 %v435_v15 }
 0x2bf   :  { %v1382_v18 = vpop.eup %1381 }
 0x2c0   :  { %v864_v19 = vrot.slane %v1382_v18, %v1559_v54  ;;  %1246 = vmatmul.mubr.msk.f32.vlgmr.msra.gmra.mrb[4].mxu0 %vm199_vm1, %v1382_v18 }
 0x2c1   :  { %1347 = vmatpush3.bf16.xpose.msk.msra.mxu0 %vm1483_vm3, %v1494_v13  ;;  %1267 = vmatprep.mubr.msk.f32.mxu0 %vm1418_vm4, %v1419_v12 }
 0x2c2   :  { %v865_v20 = vcombine.high %v864_v19, %v864_v19  ;;  %v872_v21 = vrot.slane %v864_v19, %v1559_v54  ;;  %1348 = vmatprep.subr.bf16.mxu0 %v1417_v6 }
 0x2c4   :  { %v879_v22 = vrot.slane %v865_v20, %v1559_v54  ;;  %v1004_v23 = vrot.slane %v872_v21, %v1576_v1 }
 0x2c6   :  { %v1008_v24 = vrot.slane %v879_v22, %v1576_v1  ;;  %v1065_v25 = vsel %vm1064_vm6, %v1062_v9, %v1004_v23 }
 0x2c8   :  { %v1066_v26 = vsel %vm1064_vm6, %v1063_v11, %v1008_v24 }
 0x2c9   :  { %1351 = vmatpush3.bf16.xpose.msk.msra.mxu0 %vm1483_vm3, %v1511_v16 }
 0x2ca   :  { %1360 = vmatprep.subr.bf16.mxu0 %v1417_v6 }
 0x393   :  { %v506_v28 = vpop.f32.mrb[4].mxu0 }
 0x394   :  { %v510_v29 = vadd.f32 %v506_v28, %v191_v27  ;;  %v1247_v30 = vpop.f32.mrb[5].mxu0 }
 0x396   :  { %1383 = vtanh.f32 %v510_v29 }
 0x3a0   :  { %v1384_v31 = vpop.eup %1383 }
 0x3a1   :  { %v886_v32 = vrot.slane %v1384_v31, %v1559_v54  ;;  %1257 = vmatmul.mubr.msk.f32.vlgmr.msra.gmra.mrb[4].mxu1 %vm199_vm1, %v1384_v31 }
 0x3a2   :  { %1355 = vmatpush3.bf16.xpose.msk.msra.mxu1 %vm1483_vm3, %v1494_v13  ;;  %1278 = vmatprep.mubr.msk.f32.mxu1 %vm1418_vm4, %v1419_v12 }
 0x3a3   :  { %v887_v33 = vcombine.high %v886_v32, %v886_v32  ;;  %v894_v34 = vrot.slane %v886_v32, %v1559_v54  ;;  %1356 = vmatprep.subr.bf16.mxu1 %v1417_v6 }
 0x3a5   :  { %v901_v35 = vrot.slane %v887_v33, %v1559_v54  ;;  %v1014_v36 = vrot.slane %v894_v34, %v1576_v1 }
 0x3a7   :  { %v1018_v37 = vrot.slane %v901_v35, %v1576_v1  ;;  %v1068_v38 = vsel %vm1067_vm7, %v1065_v25, %v1014_v36 }
 0x3a9   :  { %v1069_v39 = vsel %vm1067_vm7, %v1066_v26, %v1018_v37 }
 0x3aa   :  { %1359 = vmatpush3.bf16.xpose.msk.msra.mxu1 %vm1483_vm3, %v1511_v16 }
 0x474   :  { %v581_v40 = vpop.f32.mrb[4].mxu1 }
 0x475   :  { %v585_v41 = vadd.f32 %v581_v40, %v1555_v49  ;;  %v1258_v42 = vpop.f32.mrb[5].mxu1 }
 0x477   :  { %1385 = vtanh.f32 %v585_v41 }
 0x481   :  { %v1386_v43 = vpop.eup %1385 }
 0x482   :  { %v908_v44 = vrot.slane %v1386_v43, %v1559_v54  ;;  %1268 = vmatmul.mubr.msk.f32.vlgmr.msra.gmra.mrb[6].mxu0 %vm199_vm1, %v1386_v43 }
 0x483   :  { %1363 = vmatpush3.bf16.xpose.msk.msra.mxu0 %vm1483_vm3, %v1494_v13  ;;  %1289 = vmatprep.mubr.msk.f32.mxu0 %vm1418_vm4, %v1419_v12  ;;  %v192_v13 = vcombine.high %v1555_v49, %v1419_v12 }
 0x484   :  { %v909_v45 = vcombine.high %v908_v44, %v908_v44  ;;  %v916_v46 = vrot.slane %v908_v44, %v1559_v54  ;;  %1364 = vmatprep.subr.bf16.mxu0 %v1417_v6 }
 0x486   :  { %v923_v47 = vrot.slane %v909_v45, %v1559_v54  ;;  %v1024_v48 = vrot.slane %v916_v46, %v1576_v1 }
 0x488   :  { %v1028_v50 = vrot.slane %v923_v47, %v1576_v1  ;;  %v1071_v51 = vsel %vm1070_vm8, %v1068_v38, %v1024_v48 }
 0x48a   :  { %v1072_v53 = vsel %vm1070_vm8, %v1069_v39, %v1028_v50 }
 0x48b   :  { %1367 = vmatpush3.bf16.xpose.msk.msra.mxu0 %vm1483_vm3, %v1511_v16 }
 0x555   :  { %v656_v55 = vpop.f32.mrb[6].mxu0 }
 0x556   :  { %v660_v56 = vadd.f32 %v656_v55, %v192_v13  ;;  %v1269_v57 = vpop.f32.mrb[7].mxu0 }
 0x558   :  { %1387 = vtanh.f32 %v660_v56 }
 0x562   :  { %v1388_v6 = vpop.eup %1387 }
 0x563   :  { %v930_v58 = vrot.slane %v1388_v6, %v1559_v54  ;;  %1279 = vmatmul.mubr.msk.f32.vlgmr.msra.gmra.mrb[6].mxu1 %vm199_vm1, %v1388_v6 }
 0x565   :  { %v931_v59 = vcombine.high %v930_v58, %v930_v58  ;;  %v938_v60 = vrot.slane %v930_v58, %v1559_v54 }
 0x567   :  { %v945_v61 = vrot.slane %v931_v59, %v1559_v54  ;;  %v1034_v10 = vrot.slane %v938_v60, %v1576_v1 }
 0x569   :  { %v1038_v16 = vrot.slane %v945_v61, %v1576_v1  ;;  %v1074_v49 = vsel %vm1073_vm9, %v1071_v51, %v1034_v10 }
 0x56b   :  { %v1075_v62 = vsel %vm1073_vm9, %v1072_v53, %v1038_v16 }
 0x636   :  { %v731_v63 = vpop.f32.mrb[6].mxu1 }
 0x637   :  { %v735_v0 = vadd.f32 %v731_v63, %v1557_v52  ;;  %v1280_v2 = vpop.f32.mrb[7].mxu1 }
 0x639   :  { %1389 = vtanh.f32 %v735_v0 }
 0x643   :  { %v1390_v3 = vpop.eup %1389 }
 0x644   :  { %v952_v4 = vrot.slane %v1390_v3, %v1559_v54  ;;  %1290 = vmatmul.mubr.msk.f32.vlgmr.msra.gmra.mrb[8].mxu0 %vm199_vm1, %v1390_v3 }
 0x646   :  { %v953_v5 = vcombine.high %v952_v4, %v952_v4  ;;  %v960_v7 = vrot.slane %v952_v4, %v1559_v54 }
 0x648   :  { %v967_v8 = vrot.slane %v953_v5, %v1559_v54  ;;  %v1044_v9 = vrot.slane %v960_v7, %v1576_v1 }
 0x64a   :  { %v1048_v11 = vrot.slane %v967_v8, %v1576_v1  ;;  %v1077_v14 = vsel %vm1076_vm10, %v1074_v49, %v1044_v9 }
 0x64c   :  { %v1078_v15 = vsel %vm1076_vm10, %v1075_v62, %v1048_v11 }
 0x717   :  { %v806_v18 = vpop.f32.mrb[8].mxu0 }
 0x718   :  { %v810_v19 = vadd.f32 %v806_v18, %v193_v17  ;;  %v1291_v20 = vpop.f32.mrb[9].mxu0 }
 0x71a   :  { %1391 = vtanh.f32 %v810_v19 }
 0x724   :  { %v1392_v21 = vpop.eup %1391 }
 0x725   :  { %v975_v22 = vrot.slane %v1392_v21, %v1559_v54 }
 0x727   :  { %v976_v23 = vcombine.high %v975_v22, %v975_v22  ;;  %v983_v24 = vrot.slane %v975_v22, %v1559_v54 }
 0x729   :  { %v990_v25 = vrot.slane %v976_v23, %v1559_v54  ;;  %v1054_v26 = vrot.slane %v983_v24, %v1576_v1 }
 0x72b   :  { %v1058_v27 = vrot.slane %v990_v25, %v1576_v1  ;;  %v1080_v12 = vsel %vm1079_vm11, %v1077_v14, %v1054_v26 }
 0x72c   :  { %1082 = vst.msk [vmem:[#allocation2] sm:$0xff] %vm199_vm1, %v1080_v12 }
 0x72d   :  { %v1081_v52 = vsel %vm1079_vm11, %v1078_v15, %v1058_v27 }
 0x72e   :  { %1083 = vst.msk [vmem:[#allocation2 + $0x8] sm:$0xff] %vm199_vm1, %v1081_v52 }
 0x72f   :  { %1404 = shalt.err (!%p1401_p4)
}
 0x730   :  { %s1405_s17 = scalar_lea.hbm %s1685_s5, 256 }
 0x731   :  { %p1406_p5 = scmp.ne.s32.totalorder %s1685_s5, %s1405_s17  ;;  %p1409_p6 = scmp.lt.u32.totalorder %s1405_s17, %s1685_s5 }
 0x733   :  { %p1411_p7 = pnand %p1409_p6, %p1406_p5 }
 0x735   :  { %1414 = shalt.err (!%p1411_p7)
}
 0x736   :  { %s1424_s22 = smov 128   ;;  %s1425_s23 = smov 8  }
 0x737   :  { %1095 = dma.vmem_to_hbm [thread:$0]  %s1090_s4, 256, %s1685_s5, [#allocation3], %s1424_s22, %s1424_s22, %s1425_s23  }
 0x738   :  { %1415 = dma.done.wait [#allocation3], 256  }
 0x739   :  { %1416 = vsyncadd [#allocation3], 4294967040 }
 0x73a   :  { %1099 = vsyncpa [#allocation3], 1 }

</bundles_post_ra>
